<compile_context>
chip_gen: v7x
topology: tpu7x:2x2x1
jax: 0.10.0
libtpu: 0.0.40
codegen_flags: <defaults>
</compile_context>

<pallas_src>
import functools

import jax
import jax.numpy as jnp
from jax import lax
from jax.experimental import pallas as pl
from jax.experimental.pallas import tpu as pltpu

LANES = 128
SUBLANES = 8
VREG = SUBLANES * LANES  # 1024 f32 elements


def _round_up(x, m):
    return ((x + m - 1) // m) * m


def _exph_kernel(y_ref, t_ref, partial_ref, *h_refs, maxh, f0, valid_rows,
                 needs_mask):
    y = y_ref[...].astype(jnp.float32)
    t = t_ref[...].astype(jnp.float32)

    ygt = y > t
    qu = jnp.round(y / t)   # harmonic candidate for y > t
    qd = jnp.round(t / y)   # sub-harmonic candidate for y <= t
    rh = jnp.where(ygt, qu, 1.0 / qd)

    # round(1/rh) <= maxh:
    #   y >  t : rh = qu >= 1  =>  round(1/rh) in {0, 1} <= maxh   (maxh >= 1)
    #   y <= t : round(1 / (1/qd)) == qd for positive, moderate-size qd
    c_inv = jnp.logical_or(ygt, qd <= maxh)
    valid = jnp.logical_and(c_inv, rh <= maxh)
    valid = jnp.logical_and(valid, rh > 0.0)
    h = jnp.where(valid, rh, jnp.ones_like(rh))

    if h_refs:  # optional harmonic output (dtype follows the input dtype)
        h_refs[0][...] = h.astype(h_refs[0].dtype)

    # |log2((y+f0)/(h*t+f0))| == |log2(y+f0) - log2(h*t+f0)|  (drops one divide)
    elems = jnp.abs(jnp.log2(y + f0) - jnp.log2(h * t + f0))

    if needs_mask:
        # Zero contributions from rows past the end of the array (the tail
        # block's out-of-bounds rows contain stale VMEM, possibly NaN/Inf --
        # the select never propagates them).
        br = elems.shape[0]
        row_ids = (pl.program_id(0) * br
                   + lax.broadcasted_iota(jnp.int32, elems.shape, 0))
        elems = jnp.where(row_ids < valid_rows, elems, 0.0)

    # Collapse the (br,128) tile with VALU adds into one (8,128) vreg; the
    # single cross-sublane/lane reduce happens once in the wrapper, and the
    # per-step store stays lane-dense (no XLU / SMEM in the inner loop).
    br = elems.shape[0]
    partial_ref[...] = jnp.sum(
        elems.reshape(br // SUBLANES, SUBLANES, LANES), axis=0)


def exph_loss(product, target, *, maxh=8.0, f0=0.05, block_rows=1024,
              return_harmonics=False):
    """ExpHLoss.forward. Returns loss, or (loss, h) if return_harmonics."""
    assert maxh >= 1.0, "algebraic simplification assumes maxh >= 1"
    assert product.shape == target.shape and product.ndim == 1
    n = int(product.shape[0])
    assert n > 0

    # Pad (only if needed) up to a whole number of (8,128) vregs. Pad values
    # y = t = 1 compute h = 1 and a zero |log2| term, so they are inert.
    padded_n = _round_up(n, VREG)
    if padded_n != n:
        y_in = jnp.pad(product, (0, padded_n - n), constant_values=1)
        t_in = jnp.pad(target, (0, padded_n - n), constant_values=1)
    else:
        y_in, t_in = product, target
    rows = padded_n // LANES
    y2 = y_in.reshape(rows, LANES)
    t2 = t_in.reshape(rows, LANES)

    # Lane-dense (br, 128) blocks, br a multiple of 8 and <= rows.
    br = min(_round_up(max(int(block_rows), 1), SUBLANES), rows)
    # v7x has two TensorCores: make sure the "parallel" grid axis has >= 2
    # steps whenever the input is large enough so both cores get work.
    if rows > SUBLANES and pl.cdiv(rows, br) < 2:
        br = _round_up(pl.cdiv(rows, 2), SUBLANES)
    num_tiles = pl.cdiv(rows, br)
    needs_mask = (rows % br) != 0

    kernel = functools.partial(_exph_kernel, maxh=float(maxh), f0=float(f0),
                               valid_rows=rows, needs_mask=needs_mask)

    partial_shape = jax.ShapeDtypeStruct((num_tiles * SUBLANES, LANES),
                                         jnp.float32)
    partial_spec = pl.BlockSpec((SUBLANES, LANES), lambda i: (i, 0))
    io_spec = pl.BlockSpec((br, LANES), lambda i: (i, 0))

    in_bytes = (y2.size * y2.dtype.itemsize + t2.size * t2.dtype.itemsize)
    out_bytes = num_tiles * SUBLANES * LANES * 4

    if return_harmonics:
        h_dtype = product.dtype
        out_shape = (partial_shape,
                     jax.ShapeDtypeStruct((rows, LANES), h_dtype))
        out_specs = [partial_spec, io_spec]
        out_bytes += rows * LANES * jnp.dtype(h_dtype).itemsize
    else:
        out_shape = partial_shape
        out_specs = partial_spec

    cost = pl.CostEstimate(flops=14 * padded_n,
                           transcendentals=5 * padded_n,
                           bytes_accessed=int(in_bytes + out_bytes))

    result = pl.pallas_call(
        kernel,
        out_shape=out_shape,
        grid_spec=pltpu.PrefetchScalarGridSpec(
            num_scalar_prefetch=0,
            grid=(num_tiles,),
            in_specs=[io_spec, io_spec],
            out_specs=out_specs,
        ),
        compiler_params=pltpu.CompilerParams(
            # No carried state across grid steps -> shardable across TCs.
            dimension_semantics=("parallel",),
        ),
        cost_estimate=cost,
    )(y2, t2)

    if return_harmonics:
        partials, h2 = result
    else:
        partials = result

    loss = jnp.sum(partials) / jnp.float32(n)
    if not return_harmonics:
        return loss
    h_flat = h2.reshape(rows * LANES)
    h = h_flat if padded_n == n else h_flat[:n]
    # TODO(synk): the module's cross-call self._harmonics concat is host-side
    # state; the caller should accumulate the returned h.
    return loss, h


def _exph_loss_ref(product, target, maxh, f0):
    """Pure-JAX reference mirroring the PyTorch forward exactly."""
    y = product.astype(jnp.float32)
    t = target.astype(jnp.float32)
    rh = jnp.where(y > t, jnp.round(y / t), 1.0 / jnp.round(t / y))
    valid = jnp.logical_and(jnp.round(1.0 / rh) <= maxh, rh <= maxh)
    valid = jnp.logical_and(valid, rh > 0.0)
    h = jnp.where(valid, rh, jnp.ones_like(rh))
    return jnp.mean(jnp.abs(jnp.log2((y + f0) / (h * t + f0)))), h


if __name__ == "__main__":
    # Deterministic "config" (the module's __init__ reads cfg.maxh, cfg.base_freq).
    MAXH = 8.0   # cfg.maxh
    F0 = 0.05    # cfg.base_freq

    key = jax.random.PRNGKey(0)
    k1, k2, k3, k4, k5, k6 = jax.random.split(key, 6)

    # Test 1: loss-only fast path (no h store); rows=16 auto-splits into two
    # 8-row tiles so both v7x TensorCores get work.
    N1 = 2048
    p1 = jax.random.uniform(k1, (N1,), jnp.float32, minval=0.1, maxval=4.0)
    t1 = jax.random.uniform(k2, (N1,), jnp.float32, minval=0.1, maxval=4.0)
    loss1 = jax.block_until_ready(exph_loss(p1, t1, maxh=MAXH, f0=F0))
    lr1, _ = _exph_loss_ref(p1, t1, MAXH, F0)
    assert jnp.allclose(loss1, lr1, rtol=1e-5, atol=1e-6), (loss1, lr1)

    # Test 2: harmonic output + ragged length (exercises the 1-vreg pad path).
    N2 = 2000
    p2 = jax.random.uniform(k3, (N2,), jnp.float32, minval=0.1, maxval=4.0)
    t2 = jax.random.uniform(k4, (N2,), jnp.float32, minval=0.1, maxval=4.0)
    loss2, h2 = exph_loss(p2, t2, maxh=MAXH, f0=F0, block_rows=8,
                          return_harmonics=True)
    loss2 = jax.block_until_ready(loss2)
    h2 = jax.block_until_ready(h2)
    lr2, hr2 = _exph_loss_ref(p2, t2, MAXH, F0)
    assert jnp.allclose(loss2, lr2, rtol=1e-5, atol=1e-6), (loss2, lr2)
    assert jnp.allclose(h2, hr2, rtol=1e-5, atol=1e-6)

    # Test 3: uneven grid (40 rows / 16-row blocks -> masked tail block) plus
    # explicit harmonic-boundary cases at qu/qd == maxh and maxh + 1.
    N3 = 5120
    base_p = jax.random.uniform(k5, (N3,), jnp.float32, minval=0.1, maxval=4.0)
    base_t = jax.random.uniform(k6, (N3,), jnp.float32, minval=0.1, maxval=4.0)
    sp_p = jnp.array([8.0, 9.0, 1.0, 1.0, 2.5, 0.4], jnp.float32)
    sp_t = jnp.array([1.0, 1.0, 8.0, 9.0, 1.0, 1.0], jnp.float32)
    p3 = base_p.at[:6].set(sp_p)
    t3 = base_t.at[:6].set(sp_t)
    loss3, h3 = exph_loss(p3, t3, maxh=MAXH, f0=F0, block_rows=16,
                          return_harmonics=True)
    loss3 = jax.block_until_ready(loss3)
    h3 = jax.block_until_ready(h3)
    lr3, hr3 = _exph_loss_ref(p3, t3, MAXH, F0)
    assert jnp.allclose(loss3, lr3, rtol=1e-5, atol=1e-6), (loss3, lr3)
    assert jnp.allclose(h3, hr3, rtol=1e-5, atol=1e-6)
    expected = jnp.array([8.0, 1.0, 0.125, 1.0, 2.0, 0.5], jnp.float32)
    assert jnp.allclose(h3[:6], expected), h3[:6]

    # Test 4: bf16 inputs -> bf16 harmonics (traffic-matched output dtype).
    p4 = p1.astype(jnp.bfloat16)
    t4 = t1.astype(jnp.bfloat16)
    loss4, h4 = exph_loss(p4, t4, maxh=MAXH, f0=F0, return_harmonics=True)
    loss4 = jax.block_until_ready(loss4)
    h4 = jax.block_until_ready(h4)
    assert h4.dtype == jnp.bfloat16
    lr4, hr4 = _exph_loss_ref(p4, t4, MAXH, F0)
    assert jnp.allclose(loss4, lr4, rtol=1e-4, atol=1e-5), (loss4, lr4)
    assert jnp.allclose(h4.astype(jnp.float32),
                        hr4.astype(jnp.bfloat16).astype(jnp.float32))

    print("KERNEL_OK")
</pallas_src>

<mosaic_0001>
module attributes {stable_mosaic.version = 11 : i64} {
  func.func @_exph_kernel(%arg0: i32, %arg1: memref<8x128xf32, #tpu.memory_space<vmem>>, %arg2: memref<8x128xf32, #tpu.memory_space<vmem>>, %arg3: memref<8x128xf32, #tpu.memory_space<vmem>>) attributes {dimension_semantics = [#tpu.dimension_semantics<parallel>], iteration_bounds = array<i64: 2>, scalar_prefetch = 0 : i64, scratch_operands = 0 : i64, tpu.core_type = #tpu.core_type<tc>, window_params = [{transform_indices = @transform_0, window_bounds = array<i64: 8, 128>}, {transform_indices = @transform_1, window_bounds = array<i64: 8, 128>}, {transform_indices = @transform_2, window_bounds = array<i64: 8, 128>}]} {
    %c0 = arith.constant 0 : index
    %c0_0 = arith.constant 0 : index
    %0 = vector.load %arg1[%c0, %c0_0] : memref<8x128xf32, #tpu.memory_space<vmem>>, vector<8x128xf32>
    %c0_1 = arith.constant 0 : index
    %c0_2 = arith.constant 0 : index
    %1 = vector.load %arg2[%c0_1, %c0_2] : memref<8x128xf32, #tpu.memory_space<vmem>>, vector<8x128xf32>
    %2 = arith.cmpf ogt, %0, %1 : vector<8x128xf32>
    %3 = arith.divf %0, %1 : vector<8x128xf32>
    %4 = math.roundeven %3 : vector<8x128xf32>
    %5 = arith.divf %1, %0 : vector<8x128xf32>
    %6 = math.roundeven %5 : vector<8x128xf32>
    %cst = arith.constant 1.000000e+00 : f32
    %7 = vector.broadcast %cst : f32 to vector<8x128xf32>
    %8 = arith.divf %7, %6 : vector<8x128xf32>
    %9 = arith.select %2, %4, %8 : vector<8x128xi1>, vector<8x128xf32>
    %cst_3 = arith.constant 8.000000e+00 : f32
    %10 = vector.broadcast %cst_3 : f32 to vector<8x128xf32>
    %11 = arith.cmpf ole, %6, %10 : vector<8x128xf32>
    %12 = arith.ori %2, %11 : vector<8x128xi1>
    %cst_4 = arith.constant 8.000000e+00 : f32
    %13 = vector.broadcast %cst_4 : f32 to vector<8x128xf32>
    %14 = arith.cmpf ole, %9, %13 : vector<8x128xf32>
    %15 = arith.andi %12, %14 : vector<8x128xi1>
    %cst_5 = arith.constant 0.000000e+00 : f32
    %16 = vector.broadcast %cst_5 : f32 to vector<8x128xf32>
    %17 = arith.cmpf ogt, %9, %16 : vector<8x128xf32>
    %18 = arith.andi %15, %17 : vector<8x128xi1>
    %cst_6 = arith.constant 1.000000e+00 : f32
    %19 = vector.broadcast %cst_6 : f32 to vector<8x128xf32>
    %20 = arith.select %18, %9, %19 : vector<8x128xi1>, vector<8x128xf32>
    %cst_7 = arith.constant 5.000000e-02 : f32
    %21 = vector.broadcast %cst_7 : f32 to vector<8x128xf32>
    %22 = arith.addf %0, %21 : vector<8x128xf32>
    %23 = math.log %22 : vector<8x128xf32>
    %cst_8 = arith.constant 2.000000e+00 : f32
    %24 = math.log %cst_8 : f32
    %25 = vector.broadcast %24 : f32 to vector<8x128xf32>
    %26 = arith.divf %23, %25 : vector<8x128xf32>
    %27 = arith.mulf %20, %1 : vector<8x128xf32>
    %cst_9 = arith.constant 5.000000e-02 : f32
    %28 = vector.broadcast %cst_9 : f32 to vector<8x128xf32>
    %29 = arith.addf %27, %28 : vector<8x128xf32>
    %30 = math.log %29 : vector<8x128xf32>
    %cst_10 = arith.constant 2.000000e+00 : f32
    %31 = math.log %cst_10 : f32
    %32 = vector.broadcast %31 : f32 to vector<8x128xf32>
    %33 = arith.divf %30, %32 : vector<8x128xf32>
    %34 = arith.subf %26, %33 : vector<8x128xf32>
    %35 = math.absf %34 : vector<8x128xf32>
    %36 = vector.shape_cast %35 : vector<8x128xf32> to vector<1x8x128xf32>
    %cst_11 = arith.constant dense<0.000000e+00> : vector<8x128xf32>
    %37 = vector.multi_reduction <add>, %36, %cst_11 [0] : vector<1x8x128xf32> to vector<8x128xf32>
    %c0_12 = arith.constant 0 : index
    %c0_13 = arith.constant 0 : index
    %38 = vector.load %arg3[%c0_12, %c0_13] : memref<8x128xf32, #tpu.memory_space<vmem>>, vector<8x128xf32>
    tpu.vector_store %arg3[%c0_12, %c0_13], %37 {strides = array<i32>} : memref<8x128xf32, #tpu.memory_space<vmem>>, vector<8x128xf32>,
    return
  }
  func.func @transform_0(%arg0: i32) -> (i32, i32) {
    %c0_i32 = arith.constant 0 : i32
    %c0_i32_0 = arith.constant 0 : i32
    return %arg0, %c0_i32 : i32, i32
  }
  func.func @transform_1(%arg0: i32) -> (i32, i32) {
    %c0_i32 = arith.constant 0 : i32
    %c0_i32_0 = arith.constant 0 : i32
    return %arg0, %c0_i32 : i32, i32
  }
  func.func @transform_2(%arg0: i32) -> (i32, i32) {
    %c0_i32 = arith.constant 0 : i32
    %c0_i32_0 = arith.constant 0 : i32
    return %arg0, %c0_i32 : i32, i32
  }
}

</mosaic_0001>

<bundles_post_ra>
// kernel: tpu_custom_call.1
= control target key start
LH: loop header
LB: loop body
LE: loop exit
PB: predicated region body
PF: predicated region fallthrough
CT: control target
= control target key end

     0   :  { %7 = vsyncpa [#allocation3], 0  ;;  %s778_s0 = inlined_call_operand.hbm [shape: f32[16,128], index: 0, kind: input, shape index: {}]   ;;  %s779_s1 = inlined_call_operand.hbm [shape: f32[16,128], index: 1, kind: input, shape index: {}]   ;;  %s780_s2 = inlined_call_operand.hbm [shape: f32[16,128], index: 2, kind: output, shape index: {}]  }
   0x1   :  { %9 = vsyncpa [#allocation3 + $0x1], 0 }
   0x2   :  { %10 = vsyncpa [#allocation6], 0 }
   0x3   :  { %12 = vsyncpa [#allocation6 + $0x1], 0 }
   0x4   :  { %13 = vsyncpa [#allocation4], 0 }
   0x5   :  { %15 = vsyncpa [#allocation4 + $0x1], 0  ;;  %s564_s9 = smov 0   ;;  %s566_s10 = smov 0  }
   0x6   :  { %s568_s11 = smov 0   ;;  %s570_s12 = smov 0  }
   0x7 LB: > { %s585_s13 = sadd.s32 4294967295, %s544_s12   ;;  %s336_s14 = sadd.s32 4294967294, %s544_s12   ;;  %s544_s12 = sphi %s570_s12, %s799_s12   ;;  %s540_s11 = sphi %s568_s11, %s798_s11   ;;  %s536_s10 = sphi %s566_s10, %s797_s10   ;;  %s532_s9 = sphi %s564_s9, %s796_s9  }
   0x8   : > { %s589_s15 = sadd.s32 1, %s544_s12   ;;  %s28_s16 = sadd.s32 1, %s540_s11 }
   0x9   : > { %s25_s17 = ssub.s32 %s544_s12, %s589_s15  ;;  %p35_p0 = scmp.ne.s32.totalorder %s540_s11, %s536_s10 }
   0xa   : > { %p26_p1 = scmp.eq.s32.totalorder %s25_s17, 0  ;;  %p36_p2 = scmp.eq.s32.totalorder %s544_s12, 0 }
   0xb   : > { %p41_p3 = scmp.ne.s32.totalorder %s536_s10, %s532_s9  ;;  %p42_p4 = scmp.eq.s32.totalorder %s585_s13, 0 }
   0xc   : > { %s601_s18 = scalar_select %p26_p1, %s540_s11, %s28_s16  }
   0xd   : > { %p603_p5 = por %p36_p2, %p35_p0  ;;  %p607_p6 = por %p42_p4, %p41_p3 }
   0xe   : > { %p91_p7 = scmp.eq.s32.totalorder %s585_s13, 1  ;;  %p97_p8 = scmp.eq.s32.totalorder %s336_s14, 1 }
   0xf   : > { %s784_s20 = scalar_select %p607_p6, 1, 0 }
  0x10   : > { %p370_p10 = scmp.lt.s32.totalorder %s544_s12, 2  ;;  %p614_p11 = por %p91_p7, %p35_p0 }
  0x11   : > { %p618_p12 = por %p97_p8, %p41_p3  ;;  %s623_s23 = sand.u32 1, %s540_s11  }
  0x12   : > { %s785_s21 = scalar_select %p614_p11, 1, 0 }
  0x13   : > { %s786_s22 = scalar_select %p618_p12, 1, 0 }
  0x14   : > { %s340_s24 = sshll.u32 %s544_s12, 7  ;;  %s339_s25 = sshll.u32 %s623_s23, 3 }
  0x15   : > { %s632_s28 = scalar_lea.hbm %s778_s0, %s340_s24  ;;  %s121_s29 = scalar_lea.vmem [#allocation2], %s339_s25 }
  0x16   : > { %s128_s30 = sshll.u32 %s121_s29, 4  ;;  %p638_p13 = pnand %p370_p10, %p603_p5  ;;  %s642_s30 = int_to_ptr.vmem [resolvable:$true] %s128_s30 }
  0x17   : > { %s118_s4 = scalar_lea.sflag [#allocation3], %s623_s23  ;;  %s414_s5 = scalar_lea.hbm %s632_s28, 128 }
  0x18   : > { %p415_p2 = scmp.ne.s32.totalorder %s632_s28, %s414_s5  ;;  %p416_p3 = pneg %p638_p13 }
  0x19   : > { %s419_s8 = scalar_lea.hbm %s778_s0, 256  ;;  %p420_p5 = scmp.lt.u32.totalorder %s632_s28, %s778_s0 }
  0x1a   : > { %p417_p4 = pnand %p416_p3, %p415_p2  ;;  %p421_p8 = scmp.lt.u32.totalorder %s419_s8, %s414_s5 }
  0x1b   : > { %p423_p9 = scmp.lt.u32.totalorder %s414_s5, %s632_s28 }
  0x1c   : > { %p418_p7 = pneg %p417_p4  ;;  %p422_p10 = por %p421_p8, %p420_p5 }
  0x1e   : > { %p424_p0 = por %p423_p9, %p422_p10 }
  0x20   : > { %p425_p1 = pnand %p424_p0, %p418_p7 }
  0x22   : > { %428 = shalt.err (!%p425_p1)
}
  0x23   : > { %s429_s17 = scalar_lea.vmem %s642_s30, 128  ;;  %s546_s19 = smov [#allocation2]  }
  0x24   : > { %p430_p2 = scmp.ne.s32.totalorder %s642_s30, %s429_s17  ;;  %s434_s26 = sshll.u32 %s546_s19, 4  ;;  %s435_s26 = int_to_ptr.vmem [resolvable:$false] %s434_s26 }
  0x25   : > { %s436_s27 = scalar_lea.vmem %s435_s26, 256  ;;  %p437_p11 = scmp.lt.s32.totalorder %s642_s30, %s435_s26 }
  0x26   : > { %p432_p4 = pnand %p430_p2, %p416_p3  ;;  %p438_p5 = scmp.lt.s32.totalorder %s436_s27, %s429_s17 }
  0x28   : > { %p433_p12 = pneg %p432_p4  ;;  %p439_p8 = por %p438_p5, %p437_p11 }
  0x2a   : > { %p440_p9 = pnand %p439_p8, %p433_p12 }
  0x2c   : > { %443 = shalt.err (!%p440_p9)
}
  0x2d   : > { %362 = dma.hbm_to_vmem [thread:$0]  (!%p638_p13), %s632_s28, 128, %s642_s30, %s118_s4  }
  0x2e   : > { %p788_p0 = scmp.lt.s32.totalorder %s544_s12, 3  ;;  %p789_p1 = scmp.ge.s32.totalorder %s544_s12, 1 }
  0x2f   : > { %s685_s7 = scalar_lea.hbm %s779_s1, %s340_s24  ;;  %s139_s8 = scalar_lea.vmem [#allocation5], %s339_s25 }
  0x30   : > { %p676_p7 = pnand %p789_p1, %p788_p0  ;;  %s146_s14 = sshll.u32 %s139_s8, 4  ;;  %s147_s14 = int_to_ptr.vmem [resolvable:$true] %s146_s14 }
  0x31   : > { %s136_s28 = scalar_lea.sflag [#allocation6], %s623_s23  ;;  %s444_s30 = scalar_lea.hbm %s685_s7, 128 }
  0x32   : > { %s790_s29 = scalar_select %p676_p7, 1, 0 }
  0x33   : > { %p445_p11 = scmp.ne.s32.totalorder %s685_s7, %s444_s30  ;;  %s449_s24 = scalar_lea.hbm %s779_s1, 256 }
  0x34   : > { %p450_p2 = scmp.lt.u32.totalorder %s685_s7, %s779_s1  ;;  %p451_p4 = scmp.lt.u32.totalorder %s449_s24, %s444_s30 }
  0x35   : > { %p447_p12 = pnand %p445_p11, %p416_p3  ;;  %p453_p8 = scmp.lt.u32.totalorder %s444_s30, %s685_s7 }
  0x36   : > { %p452_p5 = por %p451_p4, %p450_p2 }
  0x37   : > { %p448_p10 = pneg %p447_p12 }
  0x38   : > { %p454_p9 = por %p453_p8, %p452_p5 }
  0x3a   : > { %p455_p0 = pnand %p454_p9, %p448_p10 }
  0x3c   : > { %458 = shalt.err (!%p455_p0)
}
  0x3d   : > { %s459_s23 = scalar_lea.vmem %s147_s14, 128  ;;  %s547_s25 = smov [#allocation5]  }
  0x3e   : > { %p460_p1 = scmp.ne.s32.totalorder %s147_s14, %s459_s23  ;;  %s464_s26 = sshll.u32 %s547_s25, 4  ;;  %s465_s26 = int_to_ptr.vmem [resolvable:$false] %s464_s26 }
  0x3f   : > { %s466_s27 = scalar_lea.vmem %s465_s26, 256  ;;  %p467_p6 = scmp.lt.s32.totalorder %s147_s14, %s465_s26 }
  0x40   : > { %p462_p11 = pnand %p460_p1, %p416_p3  ;;  %p468_p7 = scmp.lt.s32.totalorder %s466_s27, %s459_s23 }
  0x42   : > { %p463_p12 = pneg %p462_p11  ;;  %p469_p2 = por %p468_p7, %p467_p6 }
  0x44   : > { %p470_p4 = pnand %p469_p2, %p463_p12 }
  0x46   : > { %473 = shalt.err (!%p470_p4)
}
  0x47   : > { %365 = dma.hbm_to_vmem [thread:$0]  (!%p638_p13), %s685_s7, 128, %s147_s14, %s136_s28  }
  0x48   : > { %p791_p10 = scmp.ne.s32.totalorder %s790_s29, 0 }
  0x49   : > { %s712_s5 = sand.u32 (!%p791_p10), 1, %s536_s10   ;;  %p792_p6 = scmp.ne.s32.totalorder (!%p791_p10), %s784_s20, 0 }
  0x4a   : > { %155 = sbr.rel (%p791_p10) target bundleno = 153 (0x99), region = 28  ;;  %s715_s6 = sshll.u32 (!%p791_p10), %s712_s5, 3 }
  0x4b   : > { %s158_s8 = scalar_lea.sflag (!%p791_p10), [#allocation3], %s712_s5  ;;  %s161_s30 = scalar_lea.vmem (!%p791_p10), [#allocation2], %s715_s6 }
  0x51   : > { %519 = dma.done.wait (%p792_p6), %s158_s8, 128  }
  0x52   : > { %521 = vsyncadd (%p792_p6), %s158_s8, 4294967168  ;;  %s167_s3 = scalar_lea.sflag [#allocation6], %s712_s5  ;;  %s170_s29 = scalar_lea.vmem [#allocation5], %s715_s6 }
  0x53   : > { %523 = dma.done.wait (%p792_p6), %s167_s3, 128  }
  0x54   : > { %525 = vsyncadd (%p792_p6), %s167_s3, 4294967168  ;;  %v196_v0 = vld [vmem:[%s161_s30] sm:$0xff]  ;;  %v197_v1 = vld [vmem:[%s170_s29] sm:$0xff]  ;;  %s195_s20 = scalar_lea.vmem [#allocation7], %s715_s6  ;;  %s348_s14 = sshll.u32 %s585_s13, 7 }
  0x55   : > { %404 = vrcp.f32 %v196_v0  ;;  %vm198_vm0 = vcmp.gt.f32.partialorder %v196_v0, %v197_v1  ;;  %v215_v9 = vadd.f32 0.05, %v196_v0  ;;  %s243_s7 = sshll.u32 %s195_s20, 4  ;;  %s736_s16 = scalar_lea.hbm %s780_s2, %s348_s14  ;;  %s731_s7 = int_to_ptr.vmem [resolvable:$true] %s243_s7 }
  0x56   : > { %406 = vrcp.f32 %v197_v1  ;;  %s230_s24 = scalar_lea.sflag [#allocation4], %s712_s5  ;;  %s474_s17 = scalar_lea.vmem %s731_s7, 128 }
  0x57   : > { %p475_p13 = scmp.ne.s32.totalorder %s731_s7, %s474_s17  ;;  %p793_p3 = scmp.ne.s32.totalorder %s785_s21, 0 }
  0x58   : > { %s548_s13 = smov [#allocation7]  }
  0x59   : > { %p476_p7 = pnand %p475_p13, %p793_p3  ;;  %s478_s19 = sshll.u32 %s548_s13, 4  ;;  %s479_s19 = int_to_ptr.vmem [resolvable:$false] %s478_s19 }
  0x5a   : > { %s480_s23 = scalar_lea.vmem %s479_s19, 256  ;;  %p481_p8 = scmp.lt.s32.totalorder %s731_s7, %s479_s19 }
  0x5b   : > { %p477_p5 = pneg %p476_p7  ;;  %p482_p9 = scmp.lt.s32.totalorder %s480_s23, %s474_s17 }
  0x5d   : > { %p483_p0 = por %p482_p9, %p481_p8 }
  0x5f   : > { %v405_v2 = vpop.eup %404  ;;  %p484_p1 = pnand %p483_p0, %p477_p5 }
  0x60   : > { %v203_v3 = vmul.f32 %v405_v2, %v197_v1  ;;  %v407_v5 = vpop.eup %406 }
  0x61   : > { %v200_v6 = vmul.f32 %v407_v5, %v196_v0 }
  0x62   : > { %v352_v4 = vround.rtne.f32 %v203_v3 }
  0x63   : > { %v351_v7 = vround.rtne.f32 %v200_v6 }
  0x64   : > { %408 = vrcp.f32 %v352_v4  ;;  %vm208_vm1 = vcmp.le.f32.partialorder %v352_v4, 8.0 }
  0x65   : > { %vm209_vm2 = vmor %vm198_vm0, %vm208_vm1  ;;  %410 = vlog2.f32 %v215_v9 }
  0x6e   : > { %v409_v8 = vpop.eup %408 }
  0x6f   : > { %v207_v10 = vsel %vm198_vm0, %v351_v7, %v409_v8  ;;  %v411_v14 = vpop.eup %410 }
  0x70   : > { %vm210_vm3 = vcmp.le.f32.partialorder %v207_v10, 8.0  ;;  %vm212_vm4 = vcmp.gt.f32.partialorder %v207_v10, 0.0  ;;  %v217_v15 = vmul.f32 0.6931472, %v411_v14 }
  0x71   : > { %vm211_vm5 = vmand %vm209_vm2, %vm210_vm3 }
  0x72   : > { %vm213_vm6 = vmand %vm211_vm5, %vm212_vm4  ;;  %v219_v17 = vmul.f32 1.442695, %v217_v15 }
  0x73   : > { %v214_v11 = vsel %vm213_vm6, %v207_v10, 1.0 }
  0x74   : > { %v220_v12 = vmul.f32 %v214_v11, %v197_v1 }
  0x76   : > { %v221_v13 = vadd.f32 0.05, %v220_v12 }
  0x78   : > { %412 = vlog2.f32 %v221_v13 }
  0x82   : > { %v413_v16 = vpop.eup %412 }
  0x83   : > { %v223_v18 = vmul.f32 0.6931472, %v413_v16 }
  0x85   : > { %v224_v19 = vmul.f32 1.442695, %v223_v18 }
  0x87   : > { %v225_v20 = vsub.f32 %v219_v17, %v224_v19 }
  0x89   : > { %v226_v21 = vand.u32 2147483647, %v225_v20 }
  0x8b   : > { %228 = vst [vmem:[%s195_s20] sm:$0xff] %v226_v21 }
  0x8c   : > { %487 = shalt.err (!%p484_p1)
}
  0x8d   : > { %s488_s25 = scalar_lea.hbm %s736_s16, 128  ;;  %s492_s5 = scalar_lea.hbm %s780_s2, 256 }
  0x8e   : > { %p489_p11 = scmp.ne.s32.totalorder %s736_s16, %s488_s25  ;;  %p493_p4 = scmp.lt.u32.totalorder %s736_s16, %s780_s2 }
  0x8f   : > { %p494_p10 = scmp.lt.u32.totalorder %s492_s5, %s488_s25  ;;  %p496_p13 = scmp.lt.u32.totalorder %s488_s25, %s736_s16 }
  0x90   : > { %p490_p12 = pnand %p489_p11, %p793_p3 }
  0x91   : > { %p495_p6 = por %p494_p10, %p493_p4 }
  0x92   : > { %p491_p2 = pneg %p490_p12 }
  0x93   : > { %p497_p7 = por %p496_p13, %p495_p6 }
  0x95   : > { %p498_p5 = pnand %p497_p7, %p491_p2 }
  0x97   : > { %501 = shalt.err (!%p498_p5)
}
  0x98   : > { %357 = dma.vmem_to_hbm [thread:$0]  (%p793_p3), %s731_s7, 128, %s736_s16, %s230_s24  }
  0x99 PF: > { %s255_s30 = sand.u32 1, %s532_s9   ;;  %p794_p8 = scmp.ne.s32.totalorder %s786_s22, 0 }
  0x9a   : > { %p795_p9 = scmp.ge.s32.totalorder %s544_s12, 2  ;;  %s256_s3 = scalar_lea.sflag [#allocation4], %s255_s30 }
  0x9c   : > { %p367_p0 = pnand %p795_p9, %p794_p8 }
  0x9e   : > { %527 = dma.done.wait (!%p367_p0), %s256_s3, 128  }
  0x9f   : > { %529 = vsyncadd (!%p367_p0), %s256_s3, 4294967168  ;;  %p18_p1 = scmp.ge.s32.totalorder %s589_s15, 4   ;;  %s796_s9 = smov %s536_s10 }
  0xa0   : > { %s797_s10 = smov %s540_s11  ;;  %s798_s11 = smov %s601_s18 }
  0xa1   : > { %s799_s12 = smov %s589_s15  ;;  %20 = sbr.rel (!%p18_p1) target bundleno = 7 (0x7), region = 86 }
  0xa8   :  { %261 = vsyncpa [#allocation3], 1 }
  0xa9   :  { %263 = vsyncpa [#allocation3 + $0x1], 1 }
  0xaa   :  { %264 = vsyncpa [#allocation6], 1 }
  0xab   :  { %266 = vsyncpa [#allocation6 + $0x1], 1 }
  0xac   :  { %267 = vsyncpa [#allocation4], 1 }
  0xad   :  { %269 = vsyncpa [#allocation4 + $0x1], 1 }

</bundles_post_ra>
